<compile_context>
chip_gen: v5e
topology: v5e:2x2
jax: 0.10.0
libtpu: 0.0.40
codegen_flags: <defaults>
</compile_context>

<pallas_src>
import numpy as np
import jax
import jax.numpy as jnp
from jax.experimental import pallas as pl
from jax.experimental.pallas import tpu as pltpu


def _make_kernel(t_chunk: int, batch: int, num_cells: int, hidden: int):
    """One time-chunk of the assignment-LSTM recurrence.

    Refs:
      x_ref   : (t_chunk*B, E)  bf16, time-major rows (step t at rows [t*B,(t+1)*B))
      m_ref   : (t_chunk, B, C) f32, EXCLUSIVE routing masks
      wih_ref : (E, C*4H)       bf16, fused gate-grouped input->gate weights
      whh_ref : (H, C*4H)       bf16, fused gate-grouped hidden->gate weights
      b_ref   : (1, C*4H)       f32, fused bias (b_ih + b_hh), gate-grouped
      out_ref : (B, t_chunk*H)  f32, lane-dense output chunk
      h_ref, c_ref : (B, H)     f32, carried recurrent state (block pinned to 0)
    """
    n_sig = 3 * num_cells * hidden  # width of the sigmoid (i,f,o) column strip

    def kernel(x_ref, m_ref, wih_ref, whh_ref, b_ref, out_ref, h_ref, c_ref):
        # Zero initial recurrent state only on the first chunk
        # (reference uses zeros when lstm_states is None).
        @pl.when(pl.program_id(0) == 0)
        def _():
            h_ref[...] = jnp.zeros_like(h_ref)
            c_ref[...] = jnp.zeros_like(c_ref)

        wih = wih_ref[...]            # (E, G) bf16
        whh = whh_ref[...]            # (H, G) bf16

        # ---- hoisted input projection (+bias): one MXU matmul covers every
        #      timestep of the chunk; nothing x-dependent remains in the loop.
        gx = jnp.dot(x_ref[...], wih, preferred_element_type=jnp.float32) + b_ref[...]
        # gx: (t_chunk*B, G) f32, time-major rows.

        # Recurrent state carried in registers across the (unrolled) chunk loop.
        h = h_ref[...]                # (B, H) f32
        c = c_ref[...]
        outs = []
        for t in range(t_chunk):      # static unroll — LLO sees across steps
            rec = jnp.dot(h.astype(jnp.bfloat16), whh,
                          preferred_element_type=jnp.float32)       # (B, G)
            gates = gx[t * batch:(t + 1) * batch, :] + rec          # (B, G)

            # Gate-grouped columns: transcendentals only on their strips.
            sig = jax.nn.sigmoid(gates[:, :n_sig])                  # (B, 3*C*H)
            th = jnp.tanh(gates[:, n_sig:])                         # (B, C*H)

            m_t = m_ref[t]                                          # (B, C) f32
            new_h = jnp.zeros_like(h)
            new_c = jnp.zeros_like(c)
            for ci in range(num_cells):
                b3 = ci * 3 * hidden
                i_g = sig[:, b3: b3 + hidden]
                f_g = sig[:, b3 + hidden: b3 + 2 * hidden]
                o_g = sig[:, b3 + 2 * hidden: b3 + 3 * hidden]
                g_g = th[:, ci * hidden: (ci + 1) * hidden]

                c_ci = f_g * c + i_g * g_g
                h_ci = o_g * jnp.tanh(c_ci)

                # Exclusive-mask multiply-accumulate routing (later cell wins
                # because masks are exclusive; unassigned rows stay zero).
                m_ci = m_t[:, ci:ci + 1]                            # (B, 1)
                new_h = new_h + m_ci * h_ci
                new_c = new_c + m_ci * c_ci

            h, c = new_h, new_c
            outs.append(new_h)

        # Single lane-dense store of the whole chunk's outputs + state writeback.
        out_ref[...] = jnp.concatenate(outs, axis=1)   # (B, t_chunk*H)
        h_ref[...] = h
        c_ref[...] = c

    return kernel


def assignment_lstm_forward(tokens, input_embed, assignments,
                            W_ih, W_hh, b_ih, b_hh, *, time_chunk=None):
    """tokens: (B, S) int32; input_embed: (B, S, E) f32.
    W_ih: (C, 4H, E); W_hh: (C, 4H, H); b_ih, b_hh: (C, 4H) (PyTorch LSTMCell layout).
    Returns (combined_outputs (B, S, H), (final_h (B, H), final_c (B, H)))."""
    B, S = tokens.shape
    E = input_embed.shape[-1]
    C = W_ih.shape[0]
    H = W_hh.shape[-1]
    G = 4 * C * H

    if time_chunk is None:
        # largest divisor of S that keeps the static unroll (and VMEM chunk) small
        time_chunk = next(t for t in range(min(S, 8), 0, -1) if S % t == 0)
    assert S % time_chunk == 0, "sequence length must be divisible by time_chunk"
    # TODO(synk): pad S up to a multiple of time_chunk for arbitrary sequence lengths.
    n_chunks = S // time_chunk

    # ---- glue: EXCLUSIVE routing masks (the np.isin of the reference).
    #      Later cells win on overlapping assignments; unassigned rows -> 0.
    isin = []
    for a in assignments:
        a_arr = jnp.asarray(np.asarray(a, dtype=np.int32))
        isin.append((tokens[:, :, None] == a_arr[None, None, :]).any(-1))   # (B, S)
    excl = [None] * C
    taken = jnp.zeros((B, S), dtype=jnp.bool_)
    for ci in range(C - 1, -1, -1):
        excl[ci] = isin[ci] & (~taken)
        taken = taken | isin[ci]
    mask = jnp.transpose(jnp.stack(excl, axis=-1), (1, 0, 2)).astype(jnp.float32)  # (S,B,C)

    # ---- glue: fused, gate-grouped weights.
    #      Columns [0 : 3CH) = sigmoid gates, per-cell blocks of [i, f, o];
    #      columns [3CH : 4CH) = tanh gates, per-cell [g]. (Torch order i,f,g,o.)
    def fuse_w(W):               # (C, 4H, in) -> (in, G)
        Wi, Wf, Wg, Wo = W[:, :H], W[:, H:2 * H], W[:, 2 * H:3 * H], W[:, 3 * H:]
        sig = jnp.concatenate([Wi, Wf, Wo], axis=1).reshape(C * 3 * H, -1)
        tan = Wg.reshape(C * H, -1)
        return jnp.concatenate([sig, tan], axis=0).T

    def fuse_b(b):               # (C, 4H) -> (1, G)
        bi, bf, bg, bo = b[:, :H], b[:, H:2 * H], b[:, 2 * H:3 * H], b[:, 3 * H:]
        sig = jnp.concatenate([bi, bf, bo], axis=1).reshape(C * 3 * H)
        tan = bg.reshape(C * H)
        return jnp.concatenate([sig, tan]).reshape(1, G)

    wih_f = fuse_w(W_ih.astype(jnp.float32)).astype(jnp.bfloat16)    # (E, G)
    whh_f = fuse_w(W_hh.astype(jnp.float32)).astype(jnp.bfloat16)    # (H, G)
    bias_f = fuse_b((b_ih + b_hh).astype(jnp.float32))               # (1, G) f32

    # Time-major, row-flattened input (step t occupies rows [t*B, (t+1)*B)).
    x_flat = (jnp.transpose(input_embed, (1, 0, 2))
              .reshape(S * B, E).astype(jnp.bfloat16))

    kernel = _make_kernel(time_chunk, B, C, H)

    out_flat, h_fin, c_fin = pl.pallas_call(
        kernel,
        out_shape=[
            jax.ShapeDtypeStruct((B, S * H), jnp.float32),   # lane-dense output slab
            jax.ShapeDtypeStruct((B, H), jnp.float32),       # final hidden
            jax.ShapeDtypeStruct((B, H), jnp.float32),       # final cell
        ],
        grid=(n_chunks,),
        in_specs=[
            pl.BlockSpec((time_chunk * B, E), lambda c: (c, 0)),     # x chunk
            pl.BlockSpec((time_chunk, B, C), lambda c: (c, 0, 0)),   # mask chunk
            pl.BlockSpec((E, G), lambda c: (0, 0)),                  # fused W_ih
            pl.BlockSpec((H, G), lambda c: (0, 0)),                  # fused W_hh
            pl.BlockSpec((1, G), lambda c: (0, 0)),                  # fused bias
        ],
        out_specs=[
            pl.BlockSpec((B, time_chunk * H), lambda c: (0, c)),     # out chunk
            pl.BlockSpec((B, H), lambda c: (0, 0)),                  # carried h
            pl.BlockSpec((B, H), lambda c: (0, 0)),                  # carried c
        ],
        compiler_params=pltpu.CompilerParams(
            dimension_semantics=("arbitrary",),       # time recurrence is serial
            vmem_limit_bytes=64 * 1024 * 1024,
        ),
    )(x_flat, mask, wih_f, whh_f, bias_f)

    combined = out_flat.reshape(B, S, H)    # layout-only reshape, no transpose
    return combined, (h_fin, c_fin)


# ----------------------------- numpy reference -----------------------------
def _ref_forward(tokens, embeds, assignments, W_ih, W_hh, b_ih, b_hh):
    tokens = np.asarray(tokens)
    embeds = np.asarray(embeds, dtype=np.float32)
    B, S = tokens.shape
    H = W_hh.shape[-1]

    def sigmoid(x):
        return 1.0 / (1.0 + np.exp(-x))

    h = np.zeros((B, H), np.float32)
    c = np.zeros((B, H), np.float32)
    outs = np.zeros((B, S, H), np.float32)
    for t in range(S):
        new_h = np.zeros((B, H), np.float32)
        new_c = np.zeros((B, H), np.float32)
        for ci, assign in enumerate(assignments):
            idx = np.where(np.isin(tokens[:, t], np.asarray(assign)))[0]
            if idx.size == 0:
                continue
            x = embeds[idx, t]
            gates = x @ W_ih[ci].T + b_ih[ci] + h[idx] @ W_hh[ci].T + b_hh[ci]
            i = sigmoid(gates[:, :H])
            f = sigmoid(gates[:, H:2 * H])
            g = np.tanh(gates[:, 2 * H:3 * H])
            o = sigmoid(gates[:, 3 * H:])
            cc = f * c[idx] + i * g
            hh = o * np.tanh(cc)
            new_h[idx] = hh
            new_c[idx] = cc
        h, c = new_h, new_c
        outs[:, t] = h
    return outs, h, c


if __name__ == "__main__":
    # small shapes consistent with the module's forward
    B, S, E, H, C, VOCAB = 4, 8, 32, 32, 2, 16

    key = jax.random.PRNGKey(0)
    k_tok, k_emb, k_wih, k_whh, k_bih, k_bhh = jax.random.split(key, 6)

    tokens = jax.random.randint(k_tok, (B, S), 0, VOCAB, dtype=jnp.int32)
    input_embed = jax.random.normal(k_emb, (B, S, E), dtype=jnp.float32)

    # deterministic LSTMCell params (PyTorch layout: uniform(-1/sqrt(H), 1/sqrt(H)))
    bound = 1.0 / np.sqrt(H)
    W_ih = jax.random.uniform(k_wih, (C, 4 * H, E), jnp.float32, -bound, bound)
    W_hh = jax.random.uniform(k_whh, (C, 4 * H, H), jnp.float32, -bound, bound)
    b_ih = jax.random.uniform(k_bih, (C, 4 * H), jnp.float32, -bound, bound)
    b_hh = jax.random.uniform(k_bhh, (C, 4 * H), jnp.float32, -bound, bound)

    # Overlapping + partially-unassigned routing: tokens 6..9 belong to both
    # cells (later cell wins), tokens 14..15 belong to none (zero state path).
    assignments = [list(range(0, 10)), list(range(6, 14))]

    combined, (h_fin, c_fin) = assignment_lstm_forward(
        tokens, input_embed, assignments, W_ih, W_hh, b_ih, b_hh, time_chunk=4
    )
    jax.block_until_ready((combined, h_fin, c_fin))

    # verify against a numpy port of the PyTorch forward (bf16 matmul inputs in
    # the kernel -> relaxed tolerance vs the f32 reference)
    ref_out, ref_h, ref_c = _ref_forward(
        np.asarray(tokens), np.asarray(input_embed), assignments,
        np.asarray(W_ih), np.asarray(W_hh), np.asarray(b_ih), np.asarray(b_hh),
    )
    np.testing.assert_allclose(np.asarray(combined), ref_out, rtol=2e-2, atol=2e-2)
    np.testing.assert_allclose(np.asarray(h_fin), ref_h, rtol=2e-2, atol=2e-2)
    np.testing.assert_allclose(np.asarray(c_fin), ref_c, rtol=2e-2, atol=2e-2)

    print("KERNEL_OK")
</pallas_src>

<mosaic_0001>
module attributes {stable_mosaic.version = 11 : i64} {
  func.func @kernel(%arg0: i32, %arg1: memref<16x32xbf16, #tpu.memory_space<vmem>>, %arg2: memref<4x4x2xf32, #tpu.memory_space<vmem>>, %arg3: memref<32x256xbf16, #tpu.memory_space<vmem>>, %arg4: memref<32x256xbf16, #tpu.memory_space<vmem>>, %arg5: memref<1x256xf32, #tpu.memory_space<vmem>>, %arg6: memref<4x128xf32, #tpu.memory_space<vmem>>, %arg7: memref<4x32xf32, #tpu.memory_space<vmem>>, %arg8: memref<4x32xf32, #tpu.memory_space<vmem>>) attributes {dimension_semantics = [#tpu.dimension_semantics<arbitrary>], iteration_bounds = array<i64: 2>, scalar_prefetch = 0 : i64, scratch_operands = 0 : i64, tpu.core_type = #tpu.core_type<tc>, window_params = [{transform_indices = @transform_0, window_bounds = array<i64: 16, 32>}, {transform_indices = @transform_1, window_bounds = array<i64: 4, 4, 2>}, {pipeline_mode = #tpu.pipeline_mode<synchronous>, transform_indices = @transform_2, window_bounds = array<i64: 32, 256>}, {pipeline_mode = #tpu.pipeline_mode<synchronous>, transform_indices = @transform_3, window_bounds = array<i64: 32, 256>}, {pipeline_mode = #tpu.pipeline_mode<synchronous>, transform_indices = @transform_4, window_bounds = array<i64: 1, 256>}, {transform_indices = @transform_5, window_bounds = array<i64: 4, 128>}, {pipeline_mode = #tpu.pipeline_mode<synchronous>, transform_indices = @transform_6, window_bounds = array<i64: 4, 32>}, {pipeline_mode = #tpu.pipeline_mode<synchronous>, transform_indices = @transform_7, window_bounds = array<i64: 4, 32>}]} {
    %c0_i32 = arith.constant 0 : i32
    %0 = arith.cmpi eq, %arg0, %c0_i32 : i32
    %1 = arith.extui %0 : i1 to i32
    %c0_i32_0 = arith.constant 0 : i32
    %2 = arith.cmpi ne, %1, %c0_i32_0 : i32
    scf.if %2 {
      %cst_43 = arith.constant 0.000000e+00 : f32
      %208 = vector.broadcast %cst_43 : f32 to vector<4x32xf32>
      %c0_44 = arith.constant 0 : index
      %c0_45 = arith.constant 0 : index
      %209 = vector.load %arg7[%c0_44, %c0_45] : memref<4x32xf32, #tpu.memory_space<vmem>>, vector<4x32xf32>
      tpu.vector_store %arg7[%c0_44, %c0_45], %208 {strides = array<i32>} : memref<4x32xf32, #tpu.memory_space<vmem>>, vector<4x32xf32>,
      %cst_46 = arith.constant 0.000000e+00 : f32
      %210 = vector.broadcast %cst_46 : f32 to vector<4x32xf32>
      %c0_47 = arith.constant 0 : index
      %c0_48 = arith.constant 0 : index
      %211 = vector.load %arg8[%c0_47, %c0_48] : memref<4x32xf32, #tpu.memory_space<vmem>>, vector<4x32xf32>
      tpu.vector_store %arg8[%c0_47, %c0_48], %210 {strides = array<i32>} : memref<4x32xf32, #tpu.memory_space<vmem>>, vector<4x32xf32>,
    } else {
    }
    %c0 = arith.constant 0 : index
    %c0_1 = arith.constant 0 : index
    %3 = vector.load %arg3[%c0, %c0_1] : memref<32x256xbf16, #tpu.memory_space<vmem>>, vector<32x256xbf16>
    %c0_2 = arith.constant 0 : index
    %c0_3 = arith.constant 0 : index
    %4 = vector.load %arg4[%c0_2, %c0_3] : memref<32x256xbf16, #tpu.memory_space<vmem>>, vector<32x256xbf16>
    %c0_4 = arith.constant 0 : index
    %c0_5 = arith.constant 0 : index
    %5 = vector.load %arg1[%c0_4, %c0_5] : memref<16x32xbf16, #tpu.memory_space<vmem>>, vector<16x32xbf16>
    %cst = arith.constant dense<0.000000e+00> : vector<16x256xf32>
    %6 = tpu.matmul %5, %3, %cst {dimension_numbers = #tpu.dot_dimension_numbers<[1], [0], [0], [1], [0, 0, 1, 1], [], []>} : vector<16x32xbf16>, vector<32x256xbf16>, vector<16x256xf32> -> vector<16x256xf32>
    %c0_6 = arith.constant 0 : index
    %c0_7 = arith.constant 0 : index
    %7 = vector.load %arg5[%c0_6, %c0_7] : memref<1x256xf32, #tpu.memory_space<vmem>>, vector<1x256xf32>
    %8 = vector.broadcast %7 : vector<1x256xf32> to vector<16x256xf32>
    %9 = arith.addf %6, %8 : vector<16x256xf32>
    %c0_8 = arith.constant 0 : index
    %c0_9 = arith.constant 0 : index
    %10 = vector.load %arg7[%c0_8, %c0_9] : memref<4x32xf32, #tpu.memory_space<vmem>>, vector<4x32xf32>
    %c0_10 = arith.constant 0 : index
    %c0_11 = arith.constant 0 : index
    %11 = vector.load %arg8[%c0_10, %c0_11] : memref<4x32xf32, #tpu.memory_space<vmem>>, vector<4x32xf32>
    %12 = arith.truncf %10 : vector<4x32xf32> to vector<4x32xbf16>
    %cst_12 = arith.constant dense<0.000000e+00> : vector<4x256xf32>
    %13 = tpu.matmul %12, %4, %cst_12 {dimension_numbers = #tpu.dot_dimension_numbers<[1], [0], [0], [1], [0, 0, 1, 1], [], []>} : vector<4x32xbf16>, vector<32x256xbf16>, vector<4x256xf32> -> vector<4x256xf32>
    %14 = vector.extract_strided_slice %9 {offsets = [0, 0], sizes = [4, 256], strides = [1, 1]} : vector<16x256xf32> to vector<4x256xf32>
    %15 = arith.addf %14, %13 : vector<4x256xf32>
    %16 = vector.extract_strided_slice %15 {offsets = [0, 0], sizes = [4, 192], strides = [1, 1]} : vector<4x256xf32> to vector<4x192xf32>
    %17 = arith.negf %16 : vector<4x192xf32>
    %18 = math.exp %17 : vector<4x192xf32>
    %cst_13 = arith.constant 1.000000e+00 : f32
    %19 = vector.broadcast %cst_13 : f32 to vector<4x192xf32>
    %20 = arith.addf %19, %18 : vector<4x192xf32>
    %21 = arith.divf %19, %20 : vector<4x192xf32>
    %22 = vector.extract_strided_slice %15 {offsets = [0, 192], sizes = [4, 64], strides = [1, 1]} : vector<4x256xf32> to vector<4x64xf32>
    %23 = math.tanh %22 : vector<4x64xf32>
    %c0_14 = arith.constant 0 : index
    %c0_15 = arith.constant 0 : index
    %c0_16 = arith.constant 0 : index
    %24 = vector.load %arg2[%c0_14, %c0_15, %c0_16] : memref<4x4x2xf32, #tpu.memory_space<vmem>>, vector<1x4x2xf32>
    %25 = vector.shape_cast %24 : vector<1x4x2xf32> to vector<4x2xf32>
    %cst_17 = arith.constant 0.000000e+00 : f32
    %26 = vector.broadcast %cst_17 : f32 to vector<4x32xf32>
    %cst_18 = arith.constant 0.000000e+00 : f32
    %27 = vector.broadcast %cst_18 : f32 to vector<4x32xf32>
    %28 = vector.extract_strided_slice %21 {offsets = [0, 0], sizes = [4, 32], strides = [1, 1]} : vector<4x192xf32> to vector<4x32xf32>
    %29 = vector.extract_strided_slice %21 {offsets = [0, 32], sizes = [4, 32], strides = [1, 1]} : vector<4x192xf32> to vector<4x32xf32>
    %30 = vector.extract_strided_slice %21 {offsets = [0, 64], sizes = [4, 32], strides = [1, 1]} : vector<4x192xf32> to vector<4x32xf32>
    %31 = vector.extract_strided_slice %23 {offsets = [0, 0], sizes = [4, 32], strides = [1, 1]} : vector<4x64xf32> to vector<4x32xf32>
    %32 = arith.mulf %29, %11 : vector<4x32xf32>
    %33 = arith.mulf %28, %31 : vector<4x32xf32>
    %34 = arith.addf %32, %33 : vector<4x32xf32>
    %35 = math.tanh %34 : vector<4x32xf32>
    %36 = arith.mulf %30, %35 : vector<4x32xf32>
    %37 = vector.extract_strided_slice %25 {offsets = [0, 0], sizes = [4, 1], strides = [1, 1]} : vector<4x2xf32> to vector<4x1xf32>
    %38 = vector.broadcast %37 : vector<4x1xf32> to vector<4x32xf32>
    %39 = arith.mulf %38, %36 : vector<4x32xf32>
    %40 = arith.addf %26, %39 : vector<4x32xf32>
    %41 = vector.broadcast %37 : vector<4x1xf32> to vector<4x32xf32>
    %42 = arith.mulf %41, %34 : vector<4x32xf32>
    %43 = arith.addf %27, %42 : vector<4x32xf32>
    %44 = vector.extract_strided_slice %21 {offsets = [0, 96], sizes = [4, 32], strides = [1, 1]} : vector<4x192xf32> to vector<4x32xf32>
    %45 = vector.extract_strided_slice %21 {offsets = [0, 128], sizes = [4, 32], strides = [1, 1]} : vector<4x192xf32> to vector<4x32xf32>
    %46 = vector.extract_strided_slice %21 {offsets = [0, 160], sizes = [4, 32], strides = [1, 1]} : vector<4x192xf32> to vector<4x32xf32>
    %47 = vector.extract_strided_slice %23 {offsets = [0, 32], sizes = [4, 32], strides = [1, 1]} : vector<4x64xf32> to vector<4x32xf32>
    %48 = arith.mulf %45, %11 : vector<4x32xf32>
    %49 = arith.mulf %44, %47 : vector<4x32xf32>
    %50 = arith.addf %48, %49 : vector<4x32xf32>
    %51 = math.tanh %50 : vector<4x32xf32>
    %52 = arith.mulf %46, %51 : vector<4x32xf32>
    %53 = vector.extract_strided_slice %25 {offsets = [0, 1], sizes = [4, 1], strides = [1, 1]} : vector<4x2xf32> to vector<4x1xf32>
    %54 = vector.broadcast %53 : vector<4x1xf32> to vector<4x32xf32>
    %55 = arith.mulf %54, %52 : vector<4x32xf32>
    %56 = arith.addf %40, %55 : vector<4x32xf32>
    %57 = vector.broadcast %53 : vector<4x1xf32> to vector<4x32xf32>
    %58 = arith.mulf %57, %50 : vector<4x32xf32>
    %59 = arith.addf %43, %58 : vector<4x32xf32>
    %60 = arith.truncf %56 : vector<4x32xf32> to vector<4x32xbf16>
    %cst_19 = arith.constant dense<0.000000e+00> : vector<4x256xf32>
    %61 = tpu.matmul %60, %4, %cst_19 {dimension_numbers = #tpu.dot_dimension_numbers<[1], [0], [0], [1], [0, 0, 1, 1], [], []>} : vector<4x32xbf16>, vector<32x256xbf16>, vector<4x256xf32> -> vector<4x256xf32>
    %62 = vector.extract_strided_slice %9 {offsets = [4, 0], sizes = [4, 256], strides = [1, 1]} : vector<16x256xf32> to vector<4x256xf32>
    %63 = arith.addf %62, %61 : vector<4x256xf32>
    %64 = vector.extract_strided_slice %63 {offsets = [0, 0], sizes = [4, 192], strides = [1, 1]} : vector<4x256xf32> to vector<4x192xf32>
    %65 = arith.negf %64 : vector<4x192xf32>
    %66 = math.exp %65 : vector<4x192xf32>
    %cst_20 = arith.constant 1.000000e+00 : f32
    %67 = vector.broadcast %cst_20 : f32 to vector<4x192xf32>
    %68 = arith.addf %67, %66 : vector<4x192xf32>
    %69 = arith.divf %67, %68 : vector<4x192xf32>
    %70 = vector.extract_strided_slice %63 {offsets = [0, 192], sizes = [4, 64], strides = [1, 1]} : vector<4x256xf32> to vector<4x64xf32>
    %71 = math.tanh %70 : vector<4x64xf32>
    %c1 = arith.constant 1 : index
    %c0_21 = arith.constant 0 : index
    %c0_22 = arith.constant 0 : index
    %72 = vector.load %arg2[%c1, %c0_21, %c0_22] : memref<4x4x2xf32, #tpu.memory_space<vmem>>, vector<1x4x2xf32>
    %73 = vector.shape_cast %72 : vector<1x4x2xf32> to vector<4x2xf32>
    %cst_23 = arith.constant 0.000000e+00 : f32
    %74 = vector.broadcast %cst_23 : f32 to vector<4x32xf32>
    %cst_24 = arith.constant 0.000000e+00 : f32
    %75 = vector.broadcast %cst_24 : f32 to vector<4x32xf32>
    %76 = vector.extract_strided_slice %69 {offsets = [0, 0], sizes = [4, 32], strides = [1, 1]} : vector<4x192xf32> to vector<4x32xf32>
    %77 = vector.extract_strided_slice %69 {offsets = [0, 32], sizes = [4, 32], strides = [1, 1]} : vector<4x192xf32> to vector<4x32xf32>
    %78 = vector.extract_strided_slice %69 {offsets = [0, 64], sizes = [4, 32], strides = [1, 1]} : vector<4x192xf32> to vector<4x32xf32>
    %79 = vector.extract_strided_slice %71 {offsets = [0, 0], sizes = [4, 32], strides = [1, 1]} : vector<4x64xf32> to vector<4x32xf32>
    %80 = arith.mulf %77, %59 : vector<4x32xf32>
    %81 = arith.mulf %76, %79 : vector<4x32xf32>
    %82 = arith.addf %80, %81 : vector<4x32xf32>
    %83 = math.tanh %82 : vector<4x32xf32>
    %84 = arith.mulf %78, %83 : vector<4x32xf32>
    %85 = vector.extract_strided_slice %73 {offsets = [0, 0], sizes = [4, 1], strides = [1, 1]} : vector<4x2xf32> to vector<4x1xf32>
    %86 = vector.broadcast %85 : vector<4x1xf32> to vector<4x32xf32>
    %87 = arith.mulf %86, %84 : vector<4x32xf32>
    %88 = arith.addf %74, %87 : vector<4x32xf32>
    %89 = vector.broadcast %85 : vector<4x1xf32> to vector<4x32xf32>
    %90 = arith.mulf %89, %82 : vector<4x32xf32>
    %91 = arith.addf %75, %90 : vector<4x32xf32>
    %92 = vector.extract_strided_slice %69 {offsets = [0, 96], sizes = [4, 32], strides = [1, 1]} : vector<4x192xf32> to vector<4x32xf32>
    %93 = vector.extract_strided_slice %69 {offsets = [0, 128], sizes = [4, 32], strides = [1, 1]} : vector<4x192xf32> to vector<4x32xf32>
    %94 = vector.extract_strided_slice %69 {offsets = [0, 160], sizes = [4, 32], strides = [1, 1]} : vector<4x192xf32> to vector<4x32xf32>
    %95 = vector.extract_strided_slice %71 {offsets = [0, 32], sizes = [4, 32], strides = [1, 1]} : vector<4x64xf32> to vector<4x32xf32>
    %96 = arith.mulf %93, %59 : vector<4x32xf32>
    %97 = arith.mulf %92, %95 : vector<4x32xf32>
    %98 = arith.addf %96, %97 : vector<4x32xf32>
    %99 = math.tanh %98 : vector<4x32xf32>
    %100 = arith.mulf %94, %99 : vector<4x32xf32>
    %101 = vector.extract_strided_slice %73 {offsets = [0, 1], sizes = [4, 1], strides = [1, 1]} : vector<4x2xf32> to vector<4x1xf32>
    %102 = vector.broadcast %101 : vector<4x1xf32> to vector<4x32xf32>
    %103 = arith.mulf %102, %100 : vector<4x32xf32>
    %104 = arith.addf %88, %103 : vector<4x32xf32>
    %105 = vector.broadcast %101 : vector<4x1xf32> to vector<4x32xf32>
    %106 = arith.mulf %105, %98 : vector<4x32xf32>
    %107 = arith.addf %91, %106 : vector<4x32xf32>
    %108 = arith.truncf %104 : vector<4x32xf32> to vector<4x32xbf16>
    %cst_25 = arith.constant dense<0.000000e+00> : vector<4x256xf32>
    %109 = tpu.matmul %108, %4, %cst_25 {dimension_numbers = #tpu.dot_dimension_numbers<[1], [0], [0], [1], [0, 0, 1, 1], [], []>} : vector<4x32xbf16>, vector<32x256xbf16>, vector<4x256xf32> -> vector<4x256xf32>
    %110 = vector.extract_strided_slice %9 {offsets = [8, 0], sizes = [4, 256], strides = [1, 1]} : vector<16x256xf32> to vector<4x256xf32>
    %111 = arith.addf %110, %109 : vector<4x256xf32>
    %112 = vector.extract_strided_slice %111 {offsets = [0, 0], sizes = [4, 192], strides = [1, 1]} : vector<4x256xf32> to vector<4x192xf32>
    %113 = arith.negf %112 : vector<4x192xf32>
    %114 = math.exp %113 : vector<4x192xf32>
    %cst_26 = arith.constant 1.000000e+00 : f32
    %115 = vector.broadcast %cst_26 : f32 to vector<4x192xf32>
    %116 = arith.addf %115, %114 : vector<4x192xf32>
    %117 = arith.divf %115, %116 : vector<4x192xf32>
    %118 = vector.extract_strided_slice %111 {offsets = [0, 192], sizes = [4, 64], strides = [1, 1]} : vector<4x256xf32> to vector<4x64xf32>
    %119 = math.tanh %118 : vector<4x64xf32>
    %c2 = arith.constant 2 : index
    %c0_27 = arith.constant 0 : index
    %c0_28 = arith.constant 0 : index
    %120 = vector.load %arg2[%c2, %c0_27, %c0_28] : memref<4x4x2xf32, #tpu.memory_space<vmem>>, vector<1x4x2xf32>
    %121 = vector.shape_cast %120 : vector<1x4x2xf32> to vector<4x2xf32>
    %cst_29 = arith.constant 0.000000e+00 : f32
    %122 = vector.broadcast %cst_29 : f32 to vector<4x32xf32>
    %cst_30 = arith.constant 0.000000e+00 : f32
    %123 = vector.broadcast %cst_30 : f32 to vector<4x32xf32>
    %124 = vector.extract_strided_slice %117 {offsets = [0, 0], sizes = [4, 32], strides = [1, 1]} : vector<4x192xf32> to vector<4x32xf32>
    %125 = vector.extract_strided_slice %117 {offsets = [0, 32], sizes = [4, 32], strides = [1, 1]} : vector<4x192xf32> to vector<4x32xf32>
    %126 = vector.extract_strided_slice %117 {offsets = [0, 64], sizes = [4, 32], strides = [1, 1]} : vector<4x192xf32> to vector<4x32xf32>
    %127 = vector.extract_strided_slice %119 {offsets = [0, 0], sizes = [4, 32], strides = [1, 1]} : vector<4x64xf32> to vector<4x32xf32>
    %128 = arith.mulf %125, %107 : vector<4x32xf32>
    %129 = arith.mulf %124, %127 : vector<4x32xf32>
    %130 = arith.addf %128, %129 : vector<4x32xf32>
    %131 = math.tanh %130 : vector<4x32xf32>
    %132 = arith.mulf %126, %131 : vector<4x32xf32>
    %133 = vector.extract_strided_slice %121 {offsets = [0, 0], sizes = [4, 1], strides = [1, 1]} : vector<4x2xf32> to vector<4x1xf32>
    %134 = vector.broadcast %133 : vector<4x1xf32> to vector<4x32xf32>
    %135 = arith.mulf %134, %132 : vector<4x32xf32>
    %136 = arith.addf %122, %135 : vector<4x32xf32>
    %137 = vector.broadcast %133 : vector<4x1xf32> to vector<4x32xf32>
    %138 = arith.mulf %137, %130 : vector<4x32xf32>
    %139 = arith.addf %123, %138 : vector<4x32xf32>
    %140 = vector.extract_strided_slice %117 {offsets = [0, 96], sizes = [4, 32], strides = [1, 1]} : vector<4x192xf32> to vector<4x32xf32>
    %141 = vector.extract_strided_slice %117 {offsets = [0, 128], sizes = [4, 32], strides = [1, 1]} : vector<4x192xf32> to vector<4x32xf32>
    %142 = vector.extract_strided_slice %117 {offsets = [0, 160], sizes = [4, 32], strides = [1, 1]} : vector<4x192xf32> to vector<4x32xf32>
    %143 = vector.extract_strided_slice %119 {offsets = [0, 32], sizes = [4, 32], strides = [1, 1]} : vector<4x64xf32> to vector<4x32xf32>
    %144 = arith.mulf %141, %107 : vector<4x32xf32>
    %145 = arith.mulf %140, %143 : vector<4x32xf32>
    %146 = arith.addf %144, %145 : vector<4x32xf32>
    %147 = math.tanh %146 : vector<4x32xf32>
    %148 = arith.mulf %142, %147 : vector<4x32xf32>
    %149 = vector.extract_strided_slice %121 {offsets = [0, 1], sizes = [4, 1], strides = [1, 1]} : vector<4x2xf32> to vector<4x1xf32>
    %150 = vector.broadcast %149 : vector<4x1xf32> to vector<4x32xf32>
    %151 = arith.mulf %150, %148 : vector<4x32xf32>
    %152 = arith.addf %136, %151 : vector<4x32xf32>
    %153 = vector.broadcast %149 : vector<4x1xf32> to vector<4x32xf32>
    %154 = arith.mulf %153, %146 : vector<4x32xf32>
    %155 = arith.addf %139, %154 : vector<4x32xf32>
    %156 = arith.truncf %152 : vector<4x32xf32> to vector<4x32xbf16>
    %cst_31 = arith.constant dense<0.000000e+00> : vector<4x256xf32>
    %157 = tpu.matmul %156, %4, %cst_31 {dimension_numbers = #tpu.dot_dimension_numbers<[1], [0], [0], [1], [0, 0, 1, 1], [], []>} : vector<4x32xbf16>, vector<32x256xbf16>, vector<4x256xf32> -> vector<4x256xf32>
    %158 = vector.extract_strided_slice %9 {offsets = [12, 0], sizes = [4, 256], strides = [1, 1]} : vector<16x256xf32> to vector<4x256xf32>
    %159 = arith.addf %158, %157 : vector<4x256xf32>
    %160 = vector.extract_strided_slice %159 {offsets = [0, 0], sizes = [4, 192], strides = [1, 1]} : vector<4x256xf32> to vector<4x192xf32>
    %161 = arith.negf %160 : vector<4x192xf32>
    %162 = math.exp %161 : vector<4x192xf32>
    %cst_32 = arith.constant 1.000000e+00 : f32
    %163 = vector.broadcast %cst_32 : f32 to vector<4x192xf32>
    %164 = arith.addf %163, %162 : vector<4x192xf32>
    %165 = arith.divf %163, %164 : vector<4x192xf32>
    %166 = vector.extract_strided_slice %159 {offsets = [0, 192], sizes = [4, 64], strides = [1, 1]} : vector<4x256xf32> to vector<4x64xf32>
    %167 = math.tanh %166 : vector<4x64xf32>
    %c3 = arith.constant 3 : index
    %c0_33 = arith.constant 0 : index
    %c0_34 = arith.constant 0 : index
    %168 = vector.load %arg2[%c3, %c0_33, %c0_34] : memref<4x4x2xf32, #tpu.memory_space<vmem>>, vector<1x4x2xf32>
    %169 = vector.shape_cast %168 : vector<1x4x2xf32> to vector<4x2xf32>
    %cst_35 = arith.constant 0.000000e+00 : f32
    %170 = vector.broadcast %cst_35 : f32 to vector<4x32xf32>
    %cst_36 = arith.constant 0.000000e+00 : f32
    %171 = vector.broadcast %cst_36 : f32 to vector<4x32xf32>
    %172 = vector.extract_strided_slice %165 {offsets = [0, 0], sizes = [4, 32], strides = [1, 1]} : vector<4x192xf32> to vector<4x32xf32>
    %173 = vector.extract_strided_slice %165 {offsets = [0, 32], sizes = [4, 32], strides = [1, 1]} : vector<4x192xf32> to vector<4x32xf32>
    %174 = vector.extract_strided_slice %165 {offsets = [0, 64], sizes = [4, 32], strides = [1, 1]} : vector<4x192xf32> to vector<4x32xf32>
    %175 = vector.extract_strided_slice %167 {offsets = [0, 0], sizes = [4, 32], strides = [1, 1]} : vector<4x64xf32> to vector<4x32xf32>
    %176 = arith.mulf %173, %155 : vector<4x32xf32>
    %177 = arith.mulf %172, %175 : vector<4x32xf32>
    %178 = arith.addf %176, %177 : vector<4x32xf32>
    %179 = math.tanh %178 : vector<4x32xf32>
    %180 = arith.mulf %174, %179 : vector<4x32xf32>
    %181 = vector.extract_strided_slice %169 {offsets = [0, 0], sizes = [4, 1], strides = [1, 1]} : vector<4x2xf32> to vector<4x1xf32>
    %182 = vector.broadcast %181 : vector<4x1xf32> to vector<4x32xf32>
    %183 = arith.mulf %182, %180 : vector<4x32xf32>
    %184 = arith.addf %170, %183 : vector<4x32xf32>
    %185 = vector.broadcast %181 : vector<4x1xf32> to vector<4x32xf32>
    %186 = arith.mulf %185, %178 : vector<4x32xf32>
    %187 = arith.addf %171, %186 : vector<4x32xf32>
    %188 = vector.extract_strided_slice %165 {offsets = [0, 96], sizes = [4, 32], strides = [1, 1]} : vector<4x192xf32> to vector<4x32xf32>
    %189 = vector.extract_strided_slice %165 {offsets = [0, 128], sizes = [4, 32], strides = [1, 1]} : vector<4x192xf32> to vector<4x32xf32>
    %190 = vector.extract_strided_slice %165 {offsets = [0, 160], sizes = [4, 32], strides = [1, 1]} : vector<4x192xf32> to vector<4x32xf32>
    %191 = vector.extract_strided_slice %167 {offsets = [0, 32], sizes = [4, 32], strides = [1, 1]} : vector<4x64xf32> to vector<4x32xf32>
    %192 = arith.mulf %189, %155 : vector<4x32xf32>
    %193 = arith.mulf %188, %191 : vector<4x32xf32>
    %194 = arith.addf %192, %193 : vector<4x32xf32>
    %195 = math.tanh %194 : vector<4x32xf32>
    %196 = arith.mulf %190, %195 : vector<4x32xf32>
    %197 = vector.extract_strided_slice %169 {offsets = [0, 1], sizes = [4, 1], strides = [1, 1]} : vector<4x2xf32> to vector<4x1xf32>
    %198 = vector.broadcast %197 : vector<4x1xf32> to vector<4x32xf32>
    %199 = arith.mulf %198, %196 : vector<4x32xf32>
    %200 = arith.addf %184, %199 : vector<4x32xf32>
    %201 = vector.broadcast %197 : vector<4x1xf32> to vector<4x32xf32>
    %202 = arith.mulf %201, %194 : vector<4x32xf32>
    %203 = arith.addf %187, %202 : vector<4x32xf32>
    %204 = tpu.concatenate %56, %104, %152, %200 in 1 : vector<4x32xf32>, vector<4x32xf32>, vector<4x32xf32>, vector<4x32xf32> -> vector<4x128xf32>
    %c0_37 = arith.constant 0 : index
    %c0_38 = arith.constant 0 : index
    %205 = vector.load %arg6[%c0_37, %c0_38] : memref<4x128xf32, #tpu.memory_space<vmem>>, vector<4x128xf32>
    tpu.vector_store %arg6[%c0_37, %c0_38], %204 {strides = array<i32>} : memref<4x128xf32, #tpu.memory_space<vmem>>, vector<4x128xf32>,
    %c0_39 = arith.constant 0 : index
    %c0_40 = arith.constant 0 : index
    %206 = vector.load %arg7[%c0_39, %c0_40] : memref<4x32xf32, #tpu.memory_space<vmem>>, vector<4x32xf32>
    tpu.vector_store %arg7[%c0_39, %c0_40], %200 {strides = array<i32>} : memref<4x32xf32, #tpu.memory_space<vmem>>, vector<4x32xf32>,
    %c0_41 = arith.constant 0 : index
    %c0_42 = arith.constant 0 : index
    %207 = vector.load %arg8[%c0_41, %c0_42] : memref<4x32xf32, #tpu.memory_space<vmem>>, vector<4x32xf32>
    tpu.vector_store %arg8[%c0_41, %c0_42], %203 {strides = array<i32>} : memref<4x32xf32, #tpu.memory_space<vmem>>, vector<4x32xf32>,
    return
  }
  func.func @transform_0(%arg0: i32) -> (i32, i32) {
    %c0_i32 = arith.constant 0 : i32
    %c0_i32_0 = arith.constant 0 : i32
    return %arg0, %c0_i32 : i32, i32
  }
  func.func @transform_1(%arg0: i32) -> (i32, i32, i32) {
    %c0_i32 = arith.constant 0 : i32
    %c0_i32_0 = arith.constant 0 : i32
    %c0_i32_1 = arith.constant 0 : i32
    return %arg0, %c0_i32, %c0_i32_0 : i32, i32, i32
  }
  func.func @transform_2(%arg0: i32) -> (i32, i32) {
    %c0_i32 = arith.constant 0 : i32
    %c0_i32_0 = arith.constant 0 : i32
    %c0_i32_1 = arith.constant 0 : i32
    return %c0_i32, %c0_i32_0 : i32, i32
  }
  func.func @transform_3(%arg0: i32) -> (i32, i32) {
    %c0_i32 = arith.constant 0 : i32
    %c0_i32_0 = arith.constant 0 : i32
    %c0_i32_1 = arith.constant 0 : i32
    return %c0_i32, %c0_i32_0 : i32, i32
  }
  func.func @transform_4(%arg0: i32) -> (i32, i32) {
    %c0_i32 = arith.constant 0 : i32
    %c0_i32_0 = arith.constant 0 : i32
    %c0_i32_1 = arith.constant 0 : i32
    return %c0_i32, %c0_i32_0 : i32, i32
  }
  func.func @transform_5(%arg0: i32) -> (i32, i32) {
    %c0_i32 = arith.constant 0 : i32
    %c0_i32_0 = arith.constant 0 : i32
    return %c0_i32, %arg0 : i32, i32
  }
  func.func @transform_6(%arg0: i32) -> (i32, i32) {
    %c0_i32 = arith.constant 0 : i32
    %c0_i32_0 = arith.constant 0 : i32
    %c0_i32_1 = arith.constant 0 : i32
    return %c0_i32, %c0_i32_0 : i32, i32
  }
  func.func @transform_7(%arg0: i32) -> (i32, i32) {
    %c0_i32 = arith.constant 0 : i32
    %c0_i32_0 = arith.constant 0 : i32
    %c0_i32_1 = arith.constant 0 : i32
    return %c0_i32, %c0_i32_0 : i32, i32
  }
}

</mosaic_0001>

<bundles_post_ra>
// kernel: tpu_custom_call.1
= control target key start
LH: loop header
LB: loop body
LE: loop exit
PB: predicated region body
PF: predicated region fallthrough
CT: control target
= control target key end

     0   :  { %s1992_s0 = inlined_call_operand.hbm [shape: bf16[32,32], index: 0, kind: input, shape index: {}]   ;;  %s1993_s1 = inlined_call_operand.vmem [shape: f32[8,4,2], index: 1, kind: input, shape index: {}]   ;;  %s1994_s2 = inlined_call_operand.vmem [shape: bf16[32,256], index: 2, kind: input, shape index: {}]   ;;  %s1995_s3 = inlined_call_operand.hbm [shape: bf16[32,256], index: 3, kind: input, shape index: {}]   ;;  %s1996_s4 = inlined_call_operand.vmem [shape: f32[1,256], index: 4, kind: input, shape index: {}]   ;;  %s1997_s5 = inlined_call_operand.hbm [shape: f32[4,256], index: 5, kind: output, shape index: {0}]   ;;  %s1998_s6 = inlined_call_operand.hbm [shape: f32[4,32], index: 6, kind: output, shape index: {1}]   ;;  %s1999_s7 = inlined_call_operand.hbm [shape: f32[4,32], index: 7, kind: output, shape index: {2}]  }
   0x1   :  { %2001 = sst [smem:[#allocation15_spill]] %s1995_s3 }
   0x2   :  { %13 = vsyncpa [#allocation3], 0 }
   0x3   :  { %15 = vsyncpa [#allocation3 + $0x1], 0 }
   0x4   :  { %16 = vsyncpa [#allocation6], 0 }
   0x5   :  { %17 = vsyncpa [#allocation4], 0 }
   0x6   :  { %19 = vsyncpa [#allocation4 + $0x1], 0 }
   0x7   :  { %20 = vsyncpa [#allocation9], 0  ;;  %s1660_s24 = smov 0   ;;  %s1662_s25 = smov 0  }
   0x8   :  { %s1664_s26 = smov 0   ;;  %s1666_s27 = smov 0  }
   0x9 LB: > { %s1681_s28 = sadd.s32 4294967295, %s1605_s27   ;;  %s1183_s29 = sadd.s32 4294967294, %s1605_s27   ;;  %s1605_s27 = sphi %s1666_s27, %s2017_s27   ;;  %s1601_s26 = sphi %s1664_s26, %s2016_s26   ;;  %s1597_s25 = sphi %s1662_s25, %s2015_s25   ;;  %s1593_s24 = sphi %s1660_s24, %s2014_s24  }
   0xa   : > { %p46_p0 = scmp.ne.s32.totalorder %s1597_s25, %s1593_s24  ;;  %p47_p1 = scmp.eq.s32.totalorder %s1681_s28, 0 }
   0xb   : > { %p2000_p2 = scmp.eq.s32.totalorder %s1681_s28, 1  ;;  %p165_p3 = scmp.eq.s32.totalorder %s1183_s29, 1 }
   0xc   : > { %p1690_p4 = por %p47_p1, %p46_p0  ;;  %p1184_p5 = scmp.ge.s32.totalorder %s1605_s27, 1 }
   0xd   : > { %p1695_p6 = por %p165_p3, %p46_p0  ;;  %p214_p7 = scmp.lt.s32.totalorder %s1605_s27, 3 }
   0xe   : > { %s2004_s3 = sld [smem:[#allocation15_spill]]  ;;  %s1607_s13 = smov [#allocation5]  }
   0xf   : > { %p1704_p9 = pnand %p1184_p5, %p214_p7  ;;  %s230_s14 = sshll.u32 %s1607_s13, 4  ;;  %s231_s14 = int_to_ptr.vmem [resolvable:$true] %s230_s14 }
  0x10   : > { %s1714_s15 = sadd.s32 1, %s1605_s27   ;;  %s1608_s16 = smov 128  }
  0x11   : > { %p1288_p10 = pneg %p1704_p9  ;;  %s1609_s17 = smov 8  }
  0x12   : > { %s30_s18 = ssub.s32 %s1605_s27, %s1714_s15  ;;  %s33_s19 = sadd.s32 1, %s1601_s26 }
  0x13   : > { %p1289_p11 = pnand %p1288_p10, %p47_p1  ;;  %p31_p13 = scmp.eq.s32.totalorder %s30_s18, 0 }
  0x14   : > { %s228_s11 = sshll.u32 %s2004_s3, 4  ;;  %p40_p0 = scmp.ne.s32.totalorder %s1601_s26, %s1597_s25  ;;  %s229_s11 = int_to_ptr.hbm [resolvable:$true] %s228_s11 }
  0x15   : > { %1291 = dma.hbm_to_vmem [thread:$0]  (!%p1289_p11), %s229_s11, 512, %s231_s14, [#allocation6], %s1608_s16, %s1608_s16, %s1609_s17  }
  0x16   : > { %p41_p3 = scmp.eq.s32.totalorder %s1605_s27, 0  ;;  %p1301_p5 = scmp.lt.s32.totalorder %s1605_s27, 2 }
  0x17   : > { %s1724_s20 = scalar_select %p31_p13, %s1601_s26, %s33_s19  }
  0x18   : > { %p42_p7 = por %p41_p3, %p40_p0  ;;  %p1728_p10 = por %p2000_p2, %p40_p0 }
  0x19   : > { %s247_s22 = sand.u32 1, %s1601_s26   ;;  %s1262_s23 = sshll.u32 %s1605_s27, 3 }
  0x1a   : > { %s1187_s29 = sshll.u32 %s247_s22, 3  ;;  %s256_s11 = scalar_lea.hbm %s1992_s0, %s1262_s23 }
  0x1b   : > { %s257_s13 = sshll.u32 %s256_s11, 4  ;;  %s251_s14 = scalar_lea.vmem [#allocation2], %s1187_s29  ;;  %s258_s13 = int_to_ptr.hbm [resolvable:$true] %s257_s13 }
  0x1c   : > { %s259_s16 = sshll.u32 %s251_s14, 4  ;;  %p1739_p11 = pnand %p1301_p5, %p42_p7  ;;  %s260_s16 = int_to_ptr.vmem [resolvable:$true] %s259_s16 }
  0x1d   : > { %s248_s18 = scalar_lea.sflag [#allocation3], %s247_s22  ;;  %s1445_s19 = sshra.s32 %s258_s13, 4  ;;  %s1446_s19 = int_to_ptr.hbm [resolvable:$true] %s1445_s19 }
  0x1e   : > { %s1447_s3 = scalar_lea.hbm %s1446_s19, 8  ;;  %p1449_p0 = pneg %p1739_p11 }
  0x1f   : > { %p1448_p13 = scmp.ne.s32.totalorder %s1446_s19, %s1447_s3  ;;  %s1452_s9 = scalar_lea.hbm %s1992_s0, 16 }
  0x20   : > { %p1453_p5 = scmp.lt.s32.totalorder %s1446_s19, %s1992_s0  ;;  %p1454_p7 = scmp.lt.s32.totalorder %s1452_s9, %s1447_s3 }
  0x21   : > { %p1450_p3 = pnand %p1449_p0, %p1448_p13 }
  0x22   : > { %p1455_p2 = por %p1454_p7, %p1453_p5 }
  0x23   : > { %p1451_p12 = pneg %p1450_p3 }
  0x25   : > { %p1456_p8 = pnand %p1455_p2, %p1451_p12 }
  0x27   : > { %1459 = shalt.err (!%p1456_p8)
}
  0x28   : > { %s1610_s22 = smov 64   ;;  %s1611_s14 = smov 4  }
  0x29   : > { %1295 = dma.hbm_to_vmem [thread:$0]  (!%p1739_p11), %s258_s13, 128, %s260_s16, %s248_s18, %s1610_s22, %s1610_s22, %s1611_s14  }
  0x2a   : > { %280 = sbr.rel (%p1704_p9) target bundleno = 2555 (0x9fb), region = 40  ;;  %s1756_s23 = sand.u32 (!%p1704_p9), 1, %s1597_s25  }
  0x2b   : > { %s1191_s29 = sshll.u32 (!%p1704_p9), %s1756_s23, 3  ;;  %s283_s19 = scalar_lea.sflag (!%p1704_p9), [#allocation3], %s1756_s23 }
  0x2c   : > { %s1760_s3 = scalar_lea.vmem (!%p1704_p9), [#allocation2], %s1191_s29 }
  0x2f   : > { %1576 = dma.done.wait (%p1690_p4), %s283_s19, 128  }
  0x30   : > { %1578 = vsyncadd (%p1690_p4), %s283_s19, 4294967168 }
  0x31   : > { %1580 = dma.done.wait (%p47_p1), [#allocation6], 512  }
  0x32   : > { %1582 = vsyncadd (%p47_p1), [#allocation6], 4294966784  ;;  %s1193_s12 = sshll.u32 %s1756_s23, 2  ;;  %s1772_s13 = sshll.u32 %s1681_s28, 2 }
  0x33   : > { %p330_p2 = scmp.lt.s32.totalorder %s1772_s13, 7  ;;  %s1781_s10 = scalar_lea.vmem [#allocation7], %s1193_s12 }
  0x34   : > { %p2008_p4 = scmp.ne.s32.totalorder %s1681_s28, 0 }
  0x35   : > { %s331_s16 = scalar_select %p330_p2, %s1772_s13, 7 }
  0x36   : > { %339 = sbr.rel (%p2008_p4) target bundleno = 62 (0x3e), region = 52 }
  0x37   : > { %s1195_s17 = sshll.u32 %s331_s16, 2 }
  0x38   : > { %s1779_s30 = scalar_lea.vmem %s1993_s1, %s1195_s17 }
  0x3b   : > { %vm340_vm0 = vcmask 257024   ;;  %v1612_v0 = vmov 0.0  }
  0x3c   : > { %341 = vst.msk [vmem:[#allocation8] sm:$0xf] %vm340_vm0, %v1612_v0 }
  0x3d   : > { %342 = vst.msk [vmem:[#allocation10] sm:$0xf] %vm340_vm0, %v1612_v0 }
  0x3e PF: > { %v1265_v1 = vld [vmem:[%s1994_s2 + $0x14] sm:$0xf]  ;;  %v1213_v2 = vld [vmem:[%s1994_s2 + $0x18] sm:$0xf0]  ;;  %v1229_v3 = vld [vmem:[#allocation5 + $0x10] sm:$0xf] }
  0x3f   : > { %v1216_v4 = vor.u32 %v1265_v1, %v1213_v2  ;;  %v1270_v5 = vld [vmem:[#allocation5 + $0x14] sm:$0xf0]  ;;  %v1269_v6 = vld [vmem:[#allocation5 + $0x14] sm:$0xf]  ;;  %v1231_v7 = vld [vmem:[#allocation5 + $0x18] sm:$0xf0] }
  0x40   : > { %v1230_v8 = vor.u32 %v1270_v5, %v1229_v3  ;;  %v1234_v9 = vor.u32 %v1269_v6, %v1231_v7  ;;  %v1211_v10 = vld [vmem:[%s1994_s2 + $0x10] sm:$0xf]  ;;  %v1266_v11 = vld [vmem:[%s1994_s2 + $0x14] sm:$0xf0]  ;;  %v1263_v12 = vld [vmem:[%s1994_s2 + $0x4] sm:$0xf] }
  0x41   : > { %408 = vmatpush.bf16.msra.mxu1 %v1216_v4  ;;  %v1212_v13 = vor.u32 %v1266_v11, %v1211_v10  ;;  %v1205_v14 = vld [vmem:[%s1994_s2 + $0x8] sm:$0xf0]  ;;  %v1221_v15 = vld [vmem:[#allocation5] sm:$0xf]  ;;  %v1268_v16 = vld [vmem:[#allocation5 + $0x4] sm:$0xf0] }
  0x42   : > { %448 = vmatpush.bf16.msra.mxu2 %v1230_v8  ;;  %461 = vmatpush.bf16.msra.mxu3 %v1234_v9  ;;  %v1208_v17 = vor.u32 %v1263_v12, %v1205_v14  ;;  %v1222_v18 = vor.u32 %v1268_v16, %v1221_v15  ;;  %v1267_v19 = vld [vmem:[#allocation5 + $0x4] sm:$0xf]  ;;  %v1223_v20 = vld [vmem:[#allocation5 + $0x8] sm:$0xf0]  ;;  %v1203_v23 = vld [vmem:[%s1994_s2] sm:$0xf] }
  0x43   : > { %394 = vmatpush.bf16.msra.mxu0 %v1212_v13  ;;  %v1226_v21 = vor.u32 %v1267_v19, %v1223_v20  ;;  %v416_v22 = vld [vmem:[#allocation8] sm:$0xf]  ;;  %v1264_v24 = vld [vmem:[%s1994_s2 + $0x4] sm:$0xf0]  ;;  %vm384_vm1 = vcmask 261120   ;;  %s1613_s16 = smov 32  }
  0x44   : > { %v1271_v25 = vld [vmem:[%s1760_s3] sm:$0xff]  ;;  %v1204_v26 = vor.u32 %v1264_v24, %v1203_v23  ;;  %v1810_v27 = vld [vmem:[#allocation10] sm:$0xf]  ;;  %v418_v28 = vpack.c.bf16 %v416_v22, %v416_v22  ;;  %s1614_s18 = smov 64   ;;  %v1615_v57 = vmov 0   ;;  %v1616_v1 = vmov 1  }
  0x45   : > { %409 = vmatpush.bf16.msra.mxu1 %v1208_v17  ;;  %511 = vrot.lane.b32.xlu1 %v1810_v27, %s1613_s16  ;;  %v1821_v29 = vld [vmem:[%s1996_s4] sm:$0x3]  ;;  %s1617_s9 = smov 96   ;;  %s1055_s29 = sshll.u32 %s1998_s6, 4  ;;  %s1056_s29 = int_to_ptr.hbm [resolvable:$true] %s1055_s29 }
  0x46   : > { %449 = vmatpush.bf16.msra.mxu2 %v1222_v18  ;;  %462 = vmatpush.bf16.msra.mxu3 %v1226_v21  ;;  %v356_v30 = vperm.slane %v1821_v29, 1  ;;  %v355_v31 = vperm.slane %v1821_v29, 0  ;;  %v509_v3 = vld [vmem:[%s1779_s30] sm:$0xf]  ;;  %p2009_p1 = scmp.eq.s32.totalorder %s1681_s28, 1  ;;  %s1619_s19 = smov [#allocation10]  }
  0x47   : > { %395 = vmatpush.bf16.msra.mxu0 %v1204_v26  ;;  %1354 = vset.pattern.permute.xlu1 %v1615_v57  ;;  %s1065_s12 = sshll.u32 %s1619_s19, 4  ;;  %s1067_s17 = sshll.u32 %s1999_s7, 4  ;;  %s1066_s12 = int_to_ptr.vmem [resolvable:$true] %s1065_s12  ;;  %s1068_s17 = int_to_ptr.hbm [resolvable:$true] %s1067_s17 }
  0x48   : > { %1218 = vmatmul.msk.bf16.vlgmr.msra.gmra.mxu1 %vm384_vm1, %v1271_v25  ;;  %1353 = vset.pattern.permute.xlu2 %v1616_v1  ;;  %p2010_p8 = pmov %p2009_p1  ;;  %s1029_s14 = scalar_lea.sflag [#allocation4], %s1756_s23 }
  0x49   : > { %595 = vmatpush.bf16.msrb.mxu1 %v1234_v9  ;;  %1235 = vmatmul.msk.bf16.vlgmr.msra.gmra.mxu2 %vm384_vm1, %v418_v28 }
  0x4a   : > { %1236 = vmatmul.msk.bf16.vlgmr.msra.gmra.mxu3 %vm384_vm1, %v418_v28  ;;  %1217 = vmatmul.msk.bf16.vlgmr.msra.gmra.mxu0 %vm384_vm1, %v1271_v25 }
  0x4b   : > { %582 = vmatpush.bf16.msrb.mxu0 %v1230_v8  ;;  %745 = vmatpush.bf16.msrb.mxu3 %v1234_v9 }
  0x4c   : > { %732 = vmatpush.bf16.msrb.mxu2 %v1230_v8  ;;  %1357 = vset.pattern.permute.xlu0 %v1616_v1 }
  0x4d   : > { %596 = vmatpush.bf16.msrb.mxu1 %v1226_v21 }
  0x4f   : > { %583 = vmatpush.bf16.msrb.mxu0 %v1222_v18  ;;  %746 = vmatpush.bf16.msrb.mxu3 %v1226_v21 }
  0x50   : > { %733 = vmatpush.bf16.msrb.mxu2 %v1222_v18 }
  0x51   : > { %880 = vmatpush.bf16.msra.mxu1 %v1234_v9 }
  0x53   : > { %867 = vmatpush.bf16.msra.mxu0 %v1230_v8 }
  0x55   : > { %881 = vmatpush.bf16.msra.mxu1 %v1226_v21 }
  0x57   : > { %868 = vmatpush.bf16.msra.mxu0 %v1222_v18 }
  0xb7   : > { %v512_v15 = vpop.permute.xlu1 %511 }
  0xc5   : > { %v411_v33 = vpop.f32.mrf.mxu1 }
  0xc6   : > { %v1827_v34 = vadd.f32 %v411_v33, %v356_v30 }
  0xc7   : > { %v397_v32 = vpop.f32.mrf.mxu0 }
  0xc8   : > { %v1831_v35 = vadd.f32 %v397_v32, %v355_v31 }
  0xcc   : > { %v451_v36 = vpop.f32.mrf.mxu2 }
  0xcd   : > { %v464_v37 = vpop.f32.mrf.mxu3  ;;  %v468_v38 = vadd.f32 %v451_v36, %v1831_v35 }
  0xce   : > { %v469_v39 = vadd.f32 %v464_v37, %v1827_v34 }
  0xcf   : > { %v1237_v40 = vmul.f32 -1.442695, %v468_v38 }
  0xd0   : > { %1359 = vtanh.f32 %v469_v39  ;;  %v1238_v58 = vmul.f32 -1.442695, %v469_v39 }
  0xd1   : > { %1361 = vpow2.f32 %v1237_v40 }
  0xd4   : > { %v453_v42 = vpop.f32.mrf.mxu2 }
  0xd5   : > { %v466_v41 = vpop.f32.mrf.mxu3  ;;  %v1859_v42 = vpop.f32.mrf.mxu1 }
  0xd6   : > { %v1360_v43 = vpop.eup %1359 }
  0xd7   : > { %516 = vrot.lane.b32.xlu0 %v1360_v43, %s1614_s18  ;;  %v1362_v44 = vpop.eup %1361 }
  0xd8   : > { %v476_v45 = vadd.f32 1.0, %v1362_v44 }
  0xda   : > { %1363 = vrcp.f32 %v476_v45  ;;  %v489_v48 = vand.u32 2147483648, %v476_v45  ;;  %vm483_vm2 = vweird.f32 %v476_v45  ;;  %v487_v50 = vand.u32 2147483647, %v476_v45 }
  0xdb   : > { %1365 = vpow2.f32 %v1238_v58 }
  0xdc   : > { %v490_v52 = vor.u32 1.1754944e-38, %v489_v48  ;;  %vm488_vm5 = vcmp.eq.f32.partialorder %v487_v50, 8.507059e+37 }
  0xe0   : > { %v1364_v46 = vpop.eup %1363 }
  0xe1   : > { %v479_v47 = vmul.f32 %v1364_v46, %v476_v45  ;;  %vm484_vm3 = vweird.f32 %v1364_v46  ;;  %v1366_v59 = vpop.eup %1365 }
  0xe2   : > { %vm485_vm4 = vmor %vm483_vm2, %vm484_vm3  ;;  %v477_v60 = vadd.f32 1.0, %v1366_v59 }
  0xe3   : > { %v480_v49 = vsub.f32 1.0, %v479_v47 }
  0xe4   : > { %1367 = vrcp.f32 %v477_v60  ;;  %v504_v6 = vand.u32 2147483648, %v477_v60  ;;  %vm498_vm7 = vweird.f32 %v477_v60  ;;  %v502_v7 = vand.u32 2147483647, %v477_v60 }
  0xe5   : > { %v481_v51 = vmul.f32 %v1364_v46, %v480_v49 }
  0xe6   : > { %v505_v9 = vor.u32 1.1754944e-38, %v504_v6  ;;  %vm503_vm9 = vcmp.eq.f32.partialorder %v502_v7, 8.507059e+37 }
  0xe7   : > { %v482_v53 = vadd.f32 %v1364_v46, %v481_v51 }
  0xe9   : > { %v486_v54 = vsel %vm485_vm4, %v1364_v46, %v482_v53 }
  0xea   : > { %v491_v55 = vsel %vm488_vm5, %v490_v52, %v486_v54  ;;  %v1368_v61 = vpop.eup %1367 }
  0xeb   : > { %v541_v56 = vmul.f32 %v1360_v43, %v491_v55  ;;  %v494_v63 = vmul.f32 %v1368_v61, %v477_v60  ;;  %vm499_vm6 = vweird.f32 %v1368_v61  ;;  %v514_v16 = vmul.f32 %v512_v15, %v491_v55  ;;  %v1861_v43 = vpop.f32.mrf.mxu0 }
  0xec   : > { %vm500_vm8 = vmor %vm498_vm7, %vm499_vm6 }
  0xed   : > { %543 = vrot.lane.b32.xlu0 %v541_v56, %s1613_s16  ;;  %v495_v2 = vsub.f32 1.0, %v494_v63 }
  0xef   : > { %v496_v4 = vmul.f32 %v1368_v61, %v495_v2 }
  0xf1   : > { %v497_v5 = vadd.f32 %v1368_v61, %v496_v4 }
  0xf3   : > { %v501_v8 = vsel %vm500_vm8, %v1368_v61, %v497_v5 }
  0xf4   : > { %v506_v10 = vsel %vm503_vm9, %v505_v9, %v501_v8  ;;  %v1243_v9 = vld [vmem:[%s1779_s30 + $0x4] sm:$0xf] }
  0xf5   : > { %v540_v11 = vmul.f32 %v506_v10, %v1810_v27 }
 0x149   : > { %v517_v62 = vpop.permute.xlu0 %516 }
 0x14a   : > { %v519_v0 = vmul.f32 %v517_v62, %v491_v55 }
 0x14c   : > { %521 = vrot.lane.b32.xlu1 %v519_v0, %s1613_s16 }
 0x154   : > { %533 = vperm.xlu1 %1354, %v509_v3  }
 0x15c   : > { %1356 = vset.pattern.permute.xlu1 %v1616_v1 }
 0x15f   : > { %v544_v12 = vpop.permute.xlu0 %543 }
 0x160   : > { %v546_v13 = vadd.f32 %v544_v12, %v540_v11 }
 0x162   : > { %1369 = vtanh.f32 %v546_v13 }
 0x168   : > { %v1370_v14 = vpop.eup %1369 }
 0x169   : > { %549 = vrot.lane.b32.xlu2 %v1370_v14, %s1613_s16 }
 0x171   : > { %554 = vperm.xlu2 %1353, %v509_v3  }
 0x179   : > { %1355 = vset.pattern.permute.xlu2 %v1615_v57 }
 0x1be   : > { %v522_v17 = vpop.permute.xlu1 %521 }
 0x1bf   : > { %v524_v18 = vadd.f32 %v522_v17, %v514_v16 }
 0x1c1   : > { %1371 = vtanh.f32 %v524_v18 }
 0x1c3   : > { %v550_v19 = vpop.permute.xlu2 %549 }
 0x1c4   : > { %v552_v21 = vmul.f32 %v550_v19, %v506_v10 }
 0x1c6   : > { %v534_v25 = vpop.permute.xlu1 %533 }
 0x1c7   : > { %v1372_v20 = vpop.eup %1371  ;;  %v538_v38 = vmul.f32 %v534_v25, %v524_v18 }
 0x1c8   : > { %527 = vrot.lane.b32.xlu0 %v1372_v20, %s1613_s16 }
 0x1cb   : > { %v555_v22 = vpop.permute.xlu2 %554 }
 0x1cc   : > { %v557_v23 = vmul.f32 %v555_v22, %v552_v21  ;;  %v563_v24 = vmul.f32 %v555_v22, %v546_v13 }
 0x1ce   : > { %565 = vrot.lane.b32.xlu1 %v563_v24, %s1613_s16  ;;  %559 = vrot.lane.b32.xlu2 %v557_v23, %s1613_s16 }
 0x228   : > { %v560_v32 = vpop.permute.xlu2 %559 }
 0x23a   : > { %v528_v26 = vpop.permute.xlu0 %527 }
 0x23b   : > { %v530_v27 = vmul.f32 %v528_v26, %v491_v55 }
 0x23d   : > { %v536_v28 = vmul.f32 %v534_v25, %v530_v27 }
 0x23f   : > { %v1846_v33 = vadd.f32 %v560_v32, %v536_v28 }
 0x240   : > { %v566_v37 = vpop.permute.xlu1 %565 }
 0x241   : > { %v569_v36 = vpack.c.bf16 %v1846_v33, %v1846_v33  ;;  %v1851_v39 = vadd.f32 %v566_v37, %v538_v38 }
 0x243   : > { %571 = vrot.lane.b32.xlu0 %v569_v36, %s1614_s18  ;;  %v652_v40 = vrot.slane %v1851_v39, 4 }
 0x24b   : > { %690 = vrot.lane.b32.xlu0 %v652_v40, %s1617_s9 }
 0x2b5   : > { %v572_v41 = vpop.permute.xlu0 %571 }
 0x2b6   : > { %1239 = vmatmul.msk.bf16.vlgmr.msrb.gmra.mxu0 %vm384_vm1, %v572_v41  ;;  %1240 = vmatmul.msk.bf16.vlgmr.msrb.gmra.mxu1 %vm384_vm1, %v572_v41 }
 0x2bd   : > { %v691_v18 = vpop.permute.xlu0 %690 }
 0x333   : > { %v585_v44 = vpop.f32.mrf.mxu0  ;;  %v598_v45 = vpop.f32.mrf.mxu1 }
 0x334   : > { %v604_v46 = vrot.slane %v585_v44, 4  ;;  %v605_v47 = vrot.slane %v598_v45, 4 }
 0x336   : > { %v608_v48 = vadd.f32 %v604_v46, %v1831_v35  ;;  %v609_v49 = vadd.f32 %v605_v47, %v1827_v34 }
 0x338   : > { %v1241_v50 = vmul.f32 -1.442695, %v608_v48  ;;  %1373 = vtanh.f32 %v609_v49  ;;  %v1242_v2 = vmul.f32 -1.442695, %v609_v49 }
 0x33a   : > { %1375 = vpow2.f32 %v1241_v50 }
 0x33b   : > { %v587_v51 = vpop.f32.mrf.mxu0  ;;  %v600_v52 = vpop.f32.mrf.mxu1 }
 0x33e   : > { %v1374_v53 = vpop.eup %1373 }
 0x33f   : > { %656 = vrot.lane.b32.xlu2 %v1374_v53, %s1614_s18 }
 0x340   : > { %v1376_v54 = vpop.eup %1375 }
 0x341   : > { %v616_v55 = vadd.f32 1.0, %v1376_v54  ;;  %v1885_v54 = vld [vmem:[%s1779_s30 + $0x8] sm:$0xf] }
 0x343   : > { %1377 = vrcp.f32 %v616_v55  ;;  %v629_v60 = vand.u32 2147483648, %v616_v55  ;;  %v627_v35 = vand.u32 2147483647, %v616_v55  ;;  %vm623_vm11 = vweird.f32 %v616_v55 }
 0x344   : > { %1379 = vpow2.f32 %v1242_v2 }
 0x345   : > { %v630_v34 = vor.u32 1.1754944e-38, %v629_v60  ;;  %vm628_vm13 = vcmp.eq.f32.partialorder %v627_v35, 8.507059e+37 }
 0x349   : > { %v1378_v56 = vpop.eup %1377 }
 0x34a   : > { %v619_v58 = vmul.f32 %v1378_v56, %v616_v55  ;;  %vm624_vm10 = vweird.f32 %v1378_v56  ;;  %v1380_v3 = vpop.eup %1379  ;;  %v1891_v55 = vadd.f32 %v1859_v42, %v356_v30 }
 0x34b   : > { %vm625_vm12 = vmor %vm623_vm11, %vm624_vm10  ;;  %v617_v4 = vadd.f32 1.0, %v1380_v3 }
 0x34c   : > { %v620_v59 = vsub.f32 1.0, %v619_v58 }
 0x34d   : > { %1381 = vrcp.f32 %v617_v4  ;;  %v644_v13 = vand.u32 2147483648, %v617_v4  ;;  %vm638_vm15 = vweird.f32 %v617_v4  ;;  %v642_v14 = vand.u32 2147483647, %v617_v4 }
 0x34e   : > { %v621_v61 = vmul.f32 %v1378_v56, %v620_v59 }
 0x34f   : > { %v645_v16 = vor.u32 1.1754944e-38, %v644_v13  ;;  %vm643_vm2 = vcmp.eq.f32.partialorder %v642_v14, 8.507059e+37 }
 0x350   : > { %v622_v62 = vadd.f32 %v1378_v56, %v621_v61 }
 0x352   : > { %v626_v63 = vsel %vm625_vm12, %v1378_v56, %v622_v62  ;;  %v1896_v56 = vadd.f32 %v1861_v43, %v355_v31 }
 0x353   : > { %v631_v0 = vsel %vm628_vm13, %v630_v34, %v626_v63  ;;  %v1382_v5 = vpop.eup %1381 }
 0x354   : > { %v694_v1 = vmul.f32 %v1374_v53, %v631_v0  ;;  %v634_v7 = vmul.f32 %v1382_v5, %v617_v4  ;;  %vm639_vm14 = vweird.f32 %v1382_v5  ;;  %v654_v23 = vmul.f32 %v652_v40, %v631_v0 }
 0x355   : > { %vm640_vm0 = vmor %vm638_vm15, %vm639_vm14 }
 0x356   : > { %696 = vrot.lane.b32.xlu2 %v694_v1, %s1613_s16  ;;  %v635_v10 = vsub.f32 1.0, %v634_v7 }
 0x358   : > { %v636_v11 = vmul.f32 %v1382_v5, %v635_v10 }
 0x35a   : > { %v637_v12 = vadd.f32 %v1382_v5, %v636_v11 }
 0x35c   : > { %v641_v15 = vsel %vm640_vm0, %v1382_v5, %v637_v12 }
 0x35d   : > { %v646_v17 = vsel %vm643_vm2, %v645_v16, %v641_v15 }
 0x35e   : > { %673 = vperm.xlu2 %1355, %v1243_v9   ;;  %v693_v19 = vmul.f32 %v691_v18, %v646_v17 }
 0x399   : > { %v657_v6 = vpop.permute.xlu2 %656 }
 0x39a   : > { %v659_v8 = vmul.f32 %v657_v6, %v631_v0 }
 0x39c   : > { %661 = vrot.lane.b32.xlu1 %v659_v8, %s1613_s16 }
 0x3b0   : > { %v697_v20 = vpop.permute.xlu2 %696 }
 0x3b1   : > { %v699_v21 = vadd.f32 %v697_v20, %v693_v19 }
 0x3b3   : > { %1383 = vtanh.f32 %v699_v21  ;;  %v718_v49 = vrot.slane %v699_v21, 4 }
 0x3b8   : > { %v674_v39 = vpop.permute.xlu2 %673 }
 0x3b9   : > { %v1384_v22 = vpop.eup %1383 }
 0x3ba   : > { %702 = vrot.lane.b32.xlu1 %v1384_v22, %s1613_s16 }
 0x3c2   : > { %707 = vperm.xlu1 %1356, %v1243_v9  }
 0x3ca   : > { %1358 = vset.pattern.permute.xlu1 %v1615_v57 }
 0x40e   : > { %v662_v24 = vpop.permute.xlu1 %661 }
 0x40f   : > { %v664_v25 = vadd.f32 %v662_v24, %v654_v23 }
 0x411   : > { %1385 = vtanh.f32 %v664_v25  ;;  %v684_v57 = vrot.slane %v664_v25, 4 }
 0x417   : > { %v1386_v26 = vpop.eup %1385 }
 0x418   : > { %667 = vrot.lane.b32.xlu0 %v1386_v26, %s1613_s16 }
 0x42c   : > { %v703_v27 = vpop.permute.xlu1 %702 }
 0x42d   : > { %v705_v28 = vmul.f32 %v703_v27, %v646_v17 }
 0x42f   : > { %v711_v32 = vrot.slane %v705_v28, 4 }
 0x431   : > { %712 = vrot.lane.b32.xlu2 %v711_v32, %s1617_s9 }
 0x434   : > { %v708_v41 = vpop.permute.xlu1 %707 }
 0x435   : > { %v720_v51 = vmul.f32 %v718_v49, %v708_v41 }
 0x48a   : > { %v668_v36 = vpop.permute.xlu0 %667 }
 0x48b   : > { %v670_v37 = vmul.f32 %v668_v36, %v631_v0  ;;  %v713_v40 = vpop.permute.xlu2 %712 }
 0x48c   : > { %v715_v45 = vmul.f32 %v713_v40, %v708_v41 }
 0x48d   : > { %v677_v38 = vrot.slane %v670_v37, 4 }
 0x48f   : > { %678 = vrot.lane.b32.xlu0 %v677_v38, %s1614_s18 }
 0x497   : > { %685 = vrot.lane.b32.xlu0 %v684_v57, %s1617_s9 }
 0x501   : > { %v679_v44 = vpop.permute.xlu0 %678 }
 0x502   : > { %v681_v46 = vmul.f32 %v679_v44, %v674_v39 }
 0x504   : > { %v1877_v47 = vadd.f32 %v715_v45, %v681_v46 }
 0x506   : > { %v722_v48 = vpack.c.bf16 %v1877_v47, %v1877_v47 }
 0x508   : > { %1244 = vmatmul.msk.bf16.vlgmr.msrb.gmra.mxu2 %vm384_vm1, %v722_v48  ;;  %1245 = vmatmul.msk.bf16.vlgmr.msrb.gmra.mxu3 %vm384_vm1, %v722_v48 }
 0x509   : > { %v686_v50 = vpop.permute.xlu0 %685 }
 0x50a   : > { %v688_v52 = vmul.f32 %v686_v50, %v674_v39 }
 0x50c   : > { %v721_v53 = vadd.f32 %v720_v51, %v688_v52 }
 0x50e   : > { %796 = vrot.lane.b32.xlu0 %v721_v53, %s1613_s16 }
 0x516   : > { %839 = vperm.xlu0 %1357, %v1885_v54  }
 0x580   : > { %v797_v18 = vpop.permute.xlu0 %796 }
 0x588   : > { %v840_v24 = vpop.permute.xlu0 %839 }
 0x58b   : > { %v735_v58 = vpop.f32.mrf.mxu2  ;;  %v748_v59 = vpop.f32.mrf.mxu3 }
 0x58c   : > { %v752_v60 = vadd.f32 %v735_v58, %v1896_v56  ;;  %v753_v61 = vadd.f32 %v748_v59, %v1891_v55 }
 0x58e   : > { %v1246_v35 = vmul.f32 -1.442695, %v752_v60  ;;  %1387 = vtanh.f32 %v753_v61  ;;  %v1247_v8 = vmul.f32 -1.442695, %v753_v61 }
 0x590   : > { %1389 = vpow2.f32 %v1246_v35 }
 0x593   : > { %v737_v62 = vpop.f32.mrf.mxu2  ;;  %v750_v34 = vpop.f32.mrf.mxu3 }
 0x594   : > { %v1388_v63 = vpop.eup %1387 }
 0x595   : > { %801 = vrot.lane.b32.xlu1 %v1388_v63, %s1614_s18 }
 0x596   : > { %v1390_v30 = vpop.eup %1389 }
 0x597   : > { %v760_v42 = vadd.f32 1.0, %v1390_v30 }
 0x599   : > { %1391 = vrcp.f32 %v760_v42  ;;  %v773_v0 = vand.u32 2147483648, %v760_v42  ;;  %v771_v2 = vand.u32 2147483647, %v760_v42  ;;  %vm767_vm4 = vweird.f32 %v760_v42 }
 0x59a   : > { %1393 = vpow2.f32 %v1247_v8 }
 0x59b   : > { %v774_v4 = vor.u32 1.1754944e-38, %v773_v0  ;;  %vm772_vm6 = vcmp.eq.f32.partialorder %v771_v2, 8.507059e+37 }
 0x59f   : > { %v1392_v29 = vpop.eup %1391 }
 0x5a0   : > { %v763_v31 = vmul.f32 %v1392_v29, %v760_v42  ;;  %vm768_vm3 = vweird.f32 %v1392_v29  ;;  %v1394_v9 = vpop.eup %1393 }
 0x5a1   : > { %vm769_vm5 = vmor %vm767_vm4, %vm768_vm3  ;;  %v761_v10 = vadd.f32 1.0, %v1394_v9  ;;  %vm1025_vm4 = vcmask 257024  }
 0x5a2   : > { %v764_v43 = vsub.f32 1.0, %v763_v31 }
 0x5a3   : > { %1395 = vrcp.f32 %v761_v10  ;;  %v788_v16 = vand.u32 2147483648, %v761_v10  ;;  %vm782_vm8 = vweird.f32 %v761_v10  ;;  %v786_v17 = vand.u32 2147483647, %v761_v10 }
 0x5a4   : > { %v765_v1 = vmul.f32 %v1392_v29, %v764_v43 }
 0x5a5   : > { %v789_v20 = vor.u32 1.1754944e-38, %v788_v16  ;;  %vm787_vm10 = vcmp.eq.f32.partialorder %v786_v17, 8.507059e+37  ;;  %v1253_v17 = vld [vmem:[%s1779_s30 + $0xc] sm:$0xf]  ;;  %s1618_s30 = smov [#allocation8]  }
 0x5a6   : > { %v766_v3 = vadd.f32 %v1392_v29, %v765_v1  ;;  %s1053_s11 = sshll.u32 %s1618_s30, 4  ;;  %s1039_s30 = scalar_lea.hbm %s1997_s5, %s1772_s13  ;;  %s1054_s11 = int_to_ptr.vmem [resolvable:$true] %s1053_s11 }
 0x5a7   : > { %s1043_s22 = sshll.u32 %s1039_s30, 4  ;;  %s1044_s22 = int_to_ptr.hbm [resolvable:$true] %s1043_s22 }
 0x5a8   : > { %v770_v5 = vsel %vm769_vm5, %v1392_v29, %v766_v3  ;;  %vm1020_vm5 = vcmask 523264  }
 0x5a9   : > { %v775_v6 = vsel %vm772_vm6, %v774_v4, %v770_v5  ;;  %v1396_v11 = vpop.eup %1395  ;;  %vm1022_vm6 = vcmask 785408  }
 0x5aa   : > { %v826_v7 = vmul.f32 %v1388_v63, %v775_v6  ;;  %v778_v12 = vmul.f32 %v1396_v11, %v761_v10  ;;  %vm783_vm7 = vweird.f32 %v1396_v11  ;;  %v799_v36 = vmul.f32 %v797_v18, %v775_v6 }
 0x5ab   : > { %vm784_vm9 = vmor %vm782_vm8, %vm783_vm7 }
 0x5ac   : > { %828 = vrot.lane.b32.xlu2 %v826_v7, %s1613_s16  ;;  %v779_v13 = vsub.f32 1.0, %v778_v12 }
 0x5ae   : > { %v780_v14 = vmul.f32 %v1396_v11, %v779_v13 }
 0x5b0   : > { %v781_v15 = vadd.f32 %v1396_v11, %v780_v14 }
 0x5b2   : > { %v785_v19 = vsel %vm784_vm9, %v1396_v11, %v781_v15 }
 0x5b3   : > { %v790_v21 = vsel %vm787_vm10, %v789_v20, %v785_v19 }
 0x5b4   : > { %v825_v22 = vmul.f32 %v790_v21, %v721_v53 }
 0x606   : > { %v829_v23 = vpop.permute.xlu2 %828 }
 0x607   : > { %v831_v25 = vadd.f32 %v829_v23, %v825_v22  ;;  %v802_v26 = vpop.permute.xlu1 %801 }
 0x608   : > { %v804_v27 = vmul.f32 %v802_v26, %v775_v6 }
 0x609   : > { %1397 = vtanh.f32 %v831_v25  ;;  %v848_v28 = vmul.f32 %v840_v24, %v831_v25 }
 0x60a   : > { %806 = vrot.lane.b32.xlu1 %v804_v27, %s1613_s16 }
 0x60b   : > { %850 = vrot.lane.b32.xlu0 %v848_v28, %s1613_s16 }
 0x60f   : > { %v1398_v32 = vpop.eup %1397 }
 0x610   : > { %834 = vrot.lane.b32.xlu2 %v1398_v32, %s1613_s16 }
 0x618   : > { %818 = vperm.xlu2 %1355, %v1885_v54  }
 0x66a   : > { %v835_v39 = vpop.permute.xlu2 %834 }
 0x66b   : > { %v837_v40 = vmul.f32 %v835_v39, %v790_v21 }
 0x66d   : > { %v842_v41 = vmul.f32 %v840_v24, %v837_v40 }
 0x672   : > { %v819_v46 = vpop.permute.xlu2 %818 }
 0x67c   : > { %v807_v37 = vpop.permute.xlu1 %806 }
 0x67d   : > { %v809_v38 = vadd.f32 %v807_v37, %v799_v36  ;;  %v851_v53 = vpop.permute.xlu0 %850 }
 0x67f   : > { %1399 = vtanh.f32 %v809_v38  ;;  %v823_v51 = vmul.f32 %v819_v46, %v809_v38 }
 0x681   : > { %v1913_v54 = vadd.f32 %v851_v53, %v823_v51 }
 0x683   : > { %v937_v58 = vrot.slane %v1913_v54, 4 }
 0x685   : > { %v1400_v57 = vpop.eup %1399 }
 0x686   : > { %812 = vrot.lane.b32.xlu1 %v1400_v57, %s1613_s16 }
 0x68e   : > { %844 = vrot.lane.b32.xlu1 %v842_v41, %s1613_s16 }
 0x6f8   : > { %v813_v44 = vpop.permute.xlu1 %812 }
 0x6f9   : > { %v815_v45 = vmul.f32 %v813_v44, %v775_v6 }
 0x6fb   : > { %v821_v48 = vmul.f32 %v819_v46, %v815_v45 }
 0x700   : > { %v845_v49 = vpop.permute.xlu1 %844 }
 0x701   : > { %v1908_v50 = vadd.f32 %v845_v49, %v821_v48 }
 0x703   : > { %v854_v52 = vpack.c.bf16 %v1908_v50, %v1908_v50 }
 0x705   : > { %856 = vrot.lane.b32.xlu2 %v854_v52, %s1614_s18 }
 0x70d   : > { %975 = vrot.lane.b32.xlu2 %v937_v58, %s1617_s9 }
 0x75f   : > { %v857_v59 = vpop.permute.xlu2 %856 }
 0x760   : > { %1249 = vmatmul.msk.bf16.vlgmr.msra.gmra.mxu0 %vm384_vm1, %v857_v59  ;;  %1250 = vmatmul.msk.bf16.vlgmr.msra.gmra.mxu1 %vm384_vm1, %v857_v59 }
 0x767   : > { %v976_v26 = vpop.permute.xlu2 %975 }
 0x7dd   : > { %v870_v60 = vpop.f32.mrf.mxu0  ;;  %v883_v61 = vpop.f32.mrf.mxu1 }
 0x7de   : > { %v889_v35 = vrot.slane %v870_v60, 4  ;;  %v890_v62 = vrot.slane %v883_v61, 4 }
 0x7e0   : > { %v893_v34 = vadd.f32 %v889_v35, %v1896_v56  ;;  %v894_v63 = vadd.f32 %v890_v62, %v1891_v55 }
 0x7e2   : > { %v1251_v30 = vmul.f32 -1.442695, %v893_v34  ;;  %1401 = vtanh.f32 %v894_v63  ;;  %v1252_v10 = vmul.f32 -1.442695, %v894_v63 }
 0x7e4   : > { %1403 = vpow2.f32 %v1251_v30 }
 0x7e5   : > { %v872_v42 = vpop.f32.mrf.mxu0  ;;  %v885_v29 = vpop.f32.mrf.mxu1 }
 0x7e8   : > { %v1402_v31 = vpop.eup %1401 }
 0x7e9   : > { %941 = vrot.lane.b32.xlu1 %v1402_v31, %s1614_s18 }
 0x7ea   : > { %v1404_v43 = vpop.eup %1403 }
 0x7eb   : > { %v901_v0 = vadd.f32 1.0, %v1404_v43 }
 0x7ed   : > { %1405 = vrcp.f32 %v901_v0  ;;  %v914_v4 = vand.u32 2147483648, %v901_v0  ;;  %v912_v56 = vand.u32 2147483647, %v901_v0  ;;  %vm908_vm12 = vweird.f32 %v901_v0 }
 0x7ee   : > { %1407 = vpow2.f32 %v1252_v10 }
 0x7ef   : > { %v915_v55 = vor.u32 1.1754944e-38, %v914_v4  ;;  %vm913_vm14 = vcmp.eq.f32.partialorder %v912_v56, 8.507059e+37 }
 0x7f3   : > { %v1406_v1 = vpop.eup %1405 }
 0x7f4   : > { %v904_v2 = vmul.f32 %v1406_v1, %v901_v0  ;;  %vm909_vm11 = vweird.f32 %v1406_v1  ;;  %v1408_v11 = vpop.eup %1407 }
 0x7f5   : > { %vm910_vm13 = vmor %vm908_vm12, %vm909_vm11  ;;  %v902_v12 = vadd.f32 1.0, %v1408_v11 }
 0x7f6   : > { %v905_v3 = vsub.f32 1.0, %v904_v2 }
 0x7f7   : > { %1409 = vrcp.f32 %v902_v12  ;;  %v929_v21 = vand.u32 2147483648, %v902_v12  ;;  %vm923_vm0 = vweird.f32 %v902_v12  ;;  %v927_v22 = vand.u32 2147483647, %v902_v12 }
 0x7f8   : > { %v906_v5 = vmul.f32 %v1406_v1, %v905_v3 }
 0x7f9   : > { %v930_v24 = vor.u32 1.1754944e-38, %v929_v21  ;;  %vm928_vm3 = vcmp.eq.f32.partialorder %v927_v22, 8.507059e+37 }
 0x7fa   : > { %v907_v6 = vadd.f32 %v1406_v1, %v906_v5 }
 0x7fc   : > { %v911_v7 = vsel %vm910_vm13, %v1406_v1, %v907_v6 }
 0x7fd   : > { %v916_v8 = vsel %vm913_vm14, %v915_v55, %v911_v7  ;;  %v1410_v13 = vpop.eup %1409 }
 0x7fe   : > { %v979_v9 = vmul.f32 %v1402_v31, %v916_v8  ;;  %v919_v15 = vmul.f32 %v1410_v13, %v902_v12  ;;  %vm924_vm15 = vweird.f32 %v1410_v13  ;;  %v939_v37 = vmul.f32 %v937_v58, %v916_v8 }
 0x7ff   : > { %vm925_vm2 = vmor %vm923_vm0, %vm924_vm15 }
 0x800   : > { %981 = vrot.lane.b32.xlu1 %v979_v9, %s1613_s16  ;;  %v920_v18 = vsub.f32 1.0, %v919_v15 }
 0x802   : > { %v921_v19 = vmul.f32 %v1410_v13, %v920_v18 }
 0x804   : > { %v922_v20 = vadd.f32 %v1410_v13, %v921_v19 }
 0x806   : > { %v926_v23 = vsel %vm925_vm2, %v1410_v13, %v922_v20 }
 0x807   : > { %v931_v25 = vsel %vm928_vm3, %v930_v24, %v926_v23 }
 0x808   : > { %958 = vperm.xlu1 %1358, %v1253_v17   ;;  %v978_v27 = vmul.f32 %v976_v26, %v931_v25 }
 0x85b   : > { %v942_v14 = vpop.permute.xlu1 %941 }
 0x85c   : > { %v944_v16 = vmul.f32 %v942_v14, %v916_v8 }
 0x85e   : > { %946 = vrot.lane.b32.xlu0 %v944_v16, %s1613_s16 }
 0x872   : > { %v982_v28 = vpop.permute.xlu1 %981 }
 0x873   : > { %v984_v32 = vadd.f32 %v982_v28, %v978_v27 }
 0x875   : > { %1411 = vtanh.f32 %v984_v32  ;;  %v1003_v59 = vrot.slane %v984_v32, 4 }
 0x87a   : > { %v959_v49 = vpop.permute.xlu1 %958 }
 0x87b   : > { %v1412_v36 = vpop.eup %1411 }
 0x87c   : > { %987 = vrot.lane.b32.xlu0 %v1412_v36, %s1613_s16 }
 0x884   : > { %992 = vperm.xlu0 %1357, %v1253_v17  }
 0x88c   : > { %1008 = vrot.lane.b32.xlu0 %v1846_v33, %s1614_s18 }
 0x8d0   : > { %v947_v38 = vpop.permute.xlu0 %946 }
 0x8d1   : > { %v949_v57 = vadd.f32 %v947_v38, %v939_v37 }
 0x8d3   : > { %1413 = vtanh.f32 %v949_v57  ;;  %v969_v48 = vrot.slane %v949_v57, 4 }
 0x8d9   : > { %v1414_v39 = vpop.eup %1413 }
 0x8da   : > { %952 = vrot.lane.b32.xlu2 %v1414_v39, %s1613_s16 }
 0x8ee   : > { %v988_v40 = vpop.permute.xlu0 %987 }
 0x8ef   : > { %v990_v41 = vmul.f32 %v988_v40, %v931_v25 }
 0x8f1   : > { %v996_v44 = vrot.slane %v990_v41, 4 }
 0x8f3   : > { %997 = vrot.lane.b32.xlu1 %v996_v44, %s1617_s9 }
 0x8f6   : > { %v993_v52 = vpop.permute.xlu0 %992 }
 0x8f7   : > { %v1005_v61 = vmul.f32 %v1003_v59, %v993_v52 }
 0x8fb   : > { %1012 = vrot.lane.b32.xlu1 %v1877_v47, %s1613_s16  ;;  %s1551_s16 = scalar_lea.hbm %s1997_s5, 8 }
 0x8fe   : > { %v1009_v63 = vpop.permute.xlu0 %1008 }
 0x934   : > { %v953_v45 = vpop.permute.xlu2 %952 }
 0x935   : > { %v955_v46 = vmul.f32 %v953_v45, %v916_v8 }
 0x937   : > { %v962_v33 = vrot.slane %v955_v46, 4 }
 0x939   : > { %963 = vrot.lane.b32.xlu2 %v962_v33, %s1614_s18 }
 0x941   : > { %970 = vrot.lane.b32.xlu2 %v969_v48, %s1617_s9 }
 0x965   : > { %v998_v51 = vpop.permute.xlu1 %997 }
 0x966   : > { %v1000_v47 = vmul.f32 %v998_v51, %v993_v52 }
 0x96d   : > { %v1013_v34 = vpop.permute.xlu1 %1012 }
 0x96e   : > { %v1019_v30 = vsel %vm384_vm1, %v1009_v63, %v1013_v34 }
 0x96f   : > { %v1021_v42 = vsel %vm1020_vm5, %v1019_v30, %v1908_v50 }
 0x993   : > { %v964_v53 = vpop.permute.xlu2 %963 }
 0x994   : > { %v966_v54 = vmul.f32 %v964_v53, %v959_v49 }
 0x996   : > { %v1001_v58 = vadd.f32 %v1000_v47, %v966_v54 }
 0x998   : > { %1016 = vrot.lane.b32.xlu2 %v1001_v58, %s1617_s9  ;;  %1026 = vst.msk [vmem:[#allocation8] sm:$0xf] %vm1025_vm4, %v1001_v58 }
 0x999   : > { %1280 = dma.vmem_to_hbm [thread:$0]  (%p2009_p1), %s1054_s11, 64, %s1056_s29, [#allocation9]  }
 0x99a   : > { %s1041_s11 = sshll.u32 %s1781_s10, 4  ;;  %s1545_s29 = sshra.s32 %s1044_s22, 4  ;;  %s1042_s11 = int_to_ptr.vmem [resolvable:$true] %s1041_s11  ;;  %s1546_s29 = int_to_ptr.hbm [resolvable:$true] %s1545_s29 }
 0x99b   : > { %v971_v60 = vpop.permute.xlu2 %970  ;;  %s1547_s19 = scalar_lea.hbm %s1546_s29, 4  ;;  %p1552_p13 = scmp.lt.s32.totalorder %s1546_s29, %s1997_s5 }
 0x99c   : > { %v973_v35 = vmul.f32 %v971_v60, %v959_v49  ;;  %p1548_p9 = scmp.ne.s32.totalorder %s1546_s29, %s1547_s19  ;;  %p1553_p0 = scmp.lt.s32.totalorder %s1551_s16, %s1547_s19 }
 0x99e   : > { %v1006_v62 = vadd.f32 %v1005_v61, %v973_v35  ;;  %p1549_p12 = pnand %p1548_p9, %p1728_p10  ;;  %p1554_p3 = por %p1553_p0, %p1552_p13 }
 0x9a0   : > { %1027 = vst.msk [vmem:[#allocation10] sm:$0xf] %vm1025_vm4, %v1006_v62  ;;  %p1550_p11 = pneg %p1549_p12 }
 0x9a1   : > { %1282 = dma.vmem_to_hbm [thread:$0]  (%p2010_p8), %s1066_s12, 64, %s1068_s17, [#allocation9]  }
 0x9a2   : > { %p1555_p5 = pnand %p1554_p3, %p1550_p11 }
 0x9f2   : > { %v1017_v29 = vpop.permute.xlu2 %1016 }
 0x9f3   : > { %v1023_v31 = vsel %vm1022_vm6, %v1021_v42, %v1017_v29 }
 0x9f4   : > { %1024 = vst [vmem:[%s1781_s10] sm:$0xf] %v1023_v31 }
 0x9f5   : > { %1558 = shalt.err (!%p1555_p5)
}
 0x9f6   : > { %1278 = dma.vmem_to_hbm [thread:$0]  (%p1728_p10), %s1042_s11, 64, %s1044_s22, %s1029_s14  }
 0x9f7   : > { %p2011_p7 = pmov %p2009_p1 }
 0x9f8   : > { %p2012_p2 = pmov %p2009_p1 }
 0x9f9   : > { %1584 = dma.done.wait (%p2011_p7), [#allocation9], 128  }
 0x9fa   : > { %1586 = vsyncadd (%p2012_p2), [#allocation9], 4294967168 }
 0x9fb PF: > { %s1089_s23 = sand.u32 1, %s1593_s24   ;;  %p2013_p4 = scmp.ge.s32.totalorder %s1605_s27, 2 }
 0x9fc   : > { %s1090_s10 = scalar_lea.sflag [#allocation4], %s1089_s23 }
 0x9fd   : > { %p1297_p1 = pnand %p2013_p4, %p1695_p6 }
 0x9ff   : > { %p1298_p8 = pneg %p1297_p1 }
 0xa01   : > { %1588 = dma.done.wait (%p1298_p8), %s1090_s10, 64  }
 0xa02   : > { %1590 = vsyncadd (%p1298_p8), %s1090_s10, 4294967232  ;;  %p23_p10 = scmp.ge.s32.totalorder %s1714_s15, 4   ;;  %s2014_s24 = smov %s1597_s25 }
 0xa03   : > { %s2015_s25 = smov %s1601_s26  ;;  %s2016_s26 = smov %s1724_s20 }
 0xa04   : > { %s2017_s27 = smov %s1714_s15  ;;  %25 = sbr.rel (!%p23_p10) target bundleno = 9 (0x9), region = 115 }
 0xa09   :  { %1096 = vsyncpa [#allocation3], 1 }
 0xa0a   :  { %1098 = vsyncpa [#allocation3 + $0x1], 1 }
 0xa0b   :  { %1099 = vsyncpa [#allocation6], 1 }
 0xa0c   :  { %1100 = vsyncpa [#allocation4], 1 }
 0xa0d   :  { %1102 = vsyncpa [#allocation4 + $0x1], 1 }
 0xa0e   :  { %1103 = vsyncpa [#allocation9], 1 }

</bundles_post_ra>
